<compile_context>
chip_gen: v5e
topology: v5e:2x2
jax: 0.10.0
libtpu: 0.0.40
codegen_flags: <defaults>
</compile_context>

<pallas_src>
import jax
import jax.numpy as jnp
from jax.experimental import pallas as pl
from jax.experimental.pallas import tpu as pltpu


def _round_up(x, m):
    return ((x + m - 1) // m) * m


def _vmem_capacity_bytes():
    try:
        return int(pltpu.get_tpu_info().vmem_capacity_bytes)
    except Exception:
        return 64 * 1024 * 1024  # conservative default (v7x per-TC VMEM)


def _mlp_kernel(x_ref, w1_ref, b1_ref, w2_ref, b2_ref, o_ref, h_ref):
    # h = relu(x @ W1 + b1): computed once per batch tile (item step j == 0),
    # kept in a VMEM scratch in f32 and reused for every item-column tile.
    @pl.when(pl.program_id(1) == 0)
    def _():
        xb = x_ref[...].astype(w1_ref.dtype)  # in-kernel bf16 cast (VPU)
        h = jnp.dot(xb, w1_ref[...], preferred_element_type=jnp.float32)
        h_ref[...] = jnp.maximum(h + b1_ref[...], 0.0)

    # y = h @ W2[:, j-tile] + b2[j-tile]; epilogue stays in f32.
    y = jnp.dot(h_ref[...].astype(w2_ref.dtype), w2_ref[...],
                preferred_element_type=jnp.float32)
    y = y + b2_ref[...]
    # Numerically-stable sigmoid; divide moved to the EUP via approx recip.
    t = jnp.exp(-jnp.abs(y))
    inv = pl.reciprocal(1.0 + t, approx=True)
    o_ref[...] = jnp.where(y >= 0, inv, t * inv).astype(o_ref.dtype)


def make_base_rec_forward(w1_t, b1, w2_t, b2, *,
                          compute_dtype=jnp.bfloat16,
                          out_dtype=jnp.bfloat16,
                          tile_b=256,
                          max_tile_n=512):
    """Builds the forward closure; weight padding / bf16 cast happens once.

    w1_t: (item_num, hidden)  -- fc1.weight transposed
    b1:   (hidden,)           -- fc1.bias
    w2_t: (hidden, item_num)  -- fc4.weight transposed
    b2:   (item_num,)         -- fc4.bias
    Returned closure maps (B, item_num) f32 -> (B, item_num) out_dtype.
    """
    item_num, hidden = w1_t.shape
    f32 = jnp.float32
    cdt_size = jnp.dtype(compute_dtype).itemsize
    out_size = jnp.dtype(out_dtype).itemsize

    # ---- lane-dense padded dims -------------------------------------------
    hid_p = _round_up(hidden, 128)
    item_128 = _round_up(item_num, 128)
    if item_128 <= max_tile_n:
        tile_n = item_128
        item_p = item_128
    else:
        tile_n = max_tile_n
        item_p = _round_up(item_num, max_tile_n)

    # ---- pad + cast params once (hoisted out of the per-call path) ---------
    # Zero padding is numerically exact: padded x columns meet zero W1 rows,
    # padded hidden units are relu(0)=0 and meet zero W2 rows, padded output
    # columns are sliced off after the call.
    w1_p = jnp.zeros((item_p, hid_p), compute_dtype).at[:item_num, :hidden].set(
        w1_t.astype(compute_dtype))
    b1_p = jnp.zeros((1, hid_p), f32).at[0, :hidden].set(b1.astype(f32))
    w2_p = jnp.zeros((hid_p, item_p), compute_dtype).at[:hidden, :item_num].set(
        w2_t.astype(compute_dtype))
    b2_p = jnp.zeros((1, item_p), f32).at[0, :item_num].set(b2.astype(f32))

    vmem_cap = _vmem_capacity_bytes()

    def footprint(tb):
        # Conservative (assumes 2 buffers even where we request 1).
        return (2 * tb * item_p * 4              # x tile (f32), double-buffered
                + 2 * item_p * hid_p * cdt_size  # W1
                + 2 * hid_p * 4                  # b1
                + 2 * hid_p * tile_n * cdt_size  # W2 column tile
                + 2 * tile_n * 4                 # b2 column tile
                + 2 * tb * tile_n * out_size     # out tile, double-buffered
                + tb * hid_p * 4)                # h scratch (f32)

    state = {"single_buffer": True}  # pl.Buffered(1) support resolved lazily

    def forward(user_feature):
        B = user_feature.shape[0]
        assert user_feature.shape[1] == item_num

        # Batch tile: >= 2 tiles when possible (v7x megacore sharding of the
        # "parallel" axis), then clamped to the per-core VMEM budget.
        B_8 = _round_up(B, 8)
        if B_8 >= 16:
            tb = min(_round_up(tile_b, 8), _round_up(pl.cdiv(B_8, 2), 8))
        else:
            tb = B_8
        budget = int(vmem_cap * 0.8)
        while tb > 8 and footprint(tb) > budget:
            tb = _round_up(tb // 2, 8)
        B_p = _round_up(B, tb)

        # Pad x / slice out only when actually needed (skips two full HBM
        # passes when shapes are already aligned).
        need_pad = (B_p != B) or (item_p != item_num)
        if need_pad:
            x_p = jnp.zeros((B_p, item_p), user_feature.dtype).at[
                :B, :item_num].set(user_feature)
        else:
            x_p = user_feature

        grid = (B_p // tb, item_p // tile_n)

        cost = pl.CostEstimate(
            flops=4 * B_p * item_p * hid_p,            # two matmuls
            transcendentals=B_p * item_p,              # sigmoid exp
            bytes_accessed=(B_p * item_p * 4           # x in (f32)
                            + item_p * hid_p * cdt_size
                            + hid_p * item_p * cdt_size
                            + (hid_p + item_p) * 4     # biases
                            + B_p * item_p * out_size))

        vmem_limit = int(min(vmem_cap,
                             max(2 * footprint(tb), 32 * 1024 * 1024)))

        def run(single_buffer):
            resident = (dict(pipeline_mode=pl.Buffered(1)) if single_buffer
                        else {})
            return pl.pallas_call(
                _mlp_kernel,
                out_shape=jax.ShapeDtypeStruct((B_p, item_p), out_dtype),
                grid_spec=pltpu.PrefetchScalarGridSpec(
                    num_scalar_prefetch=0,
                    grid=grid,
                    in_specs=[
                        pl.BlockSpec((tb, item_p), lambda i, j: (i, 0)),   # x
                        pl.BlockSpec((item_p, hid_p), lambda i, j: (0, 0),
                                     **resident),                         # W1
                        pl.BlockSpec((1, hid_p), lambda i, j: (0, 0),
                                     **resident),                         # b1
                        pl.BlockSpec((hid_p, tile_n), lambda i, j: (0, j)),  # W2
                        pl.BlockSpec((1, tile_n), lambda i, j: (0, j)),      # b2
                    ],
                    out_specs=pl.BlockSpec((tb, tile_n), lambda i, j: (i, j)),
                    scratch_shapes=[pltpu.VMEM((tb, hid_p), jnp.float32)],
                ),
                compiler_params=pltpu.CompilerParams(
                    dimension_semantics=("parallel", "arbitrary"),
                    vmem_limit_bytes=vmem_limit),
                cost_estimate=cost,
            )(x_p, w1_p, b1_p, w2_p, b2_p)

        if state["single_buffer"]:
            try:
                out_p = run(True)
            except Exception:
                # This jax build rejects buffer_count=1; fall back permanently.
                state["single_buffer"] = False
                out_p = run(False)
        else:
            out_p = run(False)

        return out_p[:B, :item_num] if need_pad else out_p

    return forward


if __name__ == "__main__":
    # Small synthetic config consistent with the module.
    user_num = 8          # unused by forward (kept for module parity)
    item_num = 64
    hidden = 50           # fc1 output dim, fixed to 50 in the module
    batch = 16
    # drop_out is defined in __init__ but never used in forward() -> no-op.

    key = jax.random.PRNGKey(0)
    k_x, k_w1, k_b1, k_w2, k_b2 = jax.random.split(key, 5)

    x = jax.random.normal(k_x, (batch, item_num), dtype=jnp.float32)
    w1_t = jax.random.normal(k_w1, (item_num, hidden), dtype=jnp.float32) * 0.1
    b1 = jax.random.normal(k_b1, (hidden,), dtype=jnp.float32) * 0.1
    w2_t = jax.random.normal(k_w2, (hidden, item_num), dtype=jnp.float32) * 0.1
    b2 = jax.random.normal(k_b2, (item_num,), dtype=jnp.float32) * 0.1

    forward = make_base_rec_forward(w1_t, b1, w2_t, b2)
    out = jax.block_until_ready(forward(x))
    assert out.shape == (batch, item_num)
    out32 = out.astype(jnp.float32)

    # Reference 1: emulate the kernel arithmetic (bf16 operands, f32 accum).
    xb = x.astype(jnp.bfloat16)
    h_b = jnp.maximum(
        jnp.dot(xb, w1_t.astype(jnp.bfloat16),
                preferred_element_type=jnp.float32) + b1, 0.0)
    y_bf16_ref = jax.nn.sigmoid(
        jnp.dot(h_b.astype(jnp.bfloat16), w2_t.astype(jnp.bfloat16),
                preferred_element_type=jnp.float32) + b2)

    # Reference 2: pure f32 forward (PyTorch-equivalent semantics).
    h32 = jnp.maximum(x @ w1_t + b1, 0.0)
    y_f32_ref = jax.nn.sigmoid(h32 @ w2_t + b2)

    assert jnp.allclose(out32, y_bf16_ref, atol=1e-2, rtol=0.0)
    assert jnp.allclose(out32, y_f32_ref, atol=3e-2, rtol=0.0)

    print("KERNEL_OK")
</pallas_src>

<mosaic_0001>
module attributes {stable_mosaic.version = 11 : i64} {
  func.func @_mlp_kernel(%arg0: i32, %arg1: i32, %arg2: memref<8x128xf32, #tpu.memory_space<vmem>>, %arg3: memref<128x128xbf16, #tpu.memory_space<vmem>>, %arg4: memref<1x128xf32, #tpu.memory_space<vmem>>, %arg5: memref<128x128xbf16, #tpu.memory_space<vmem>>, %arg6: memref<1x128xf32, #tpu.memory_space<vmem>>, %arg7: memref<8x128xbf16, #tpu.memory_space<vmem>>, %arg8: memref<8x128xf32, #tpu.memory_space<vmem>>) attributes {dimension_semantics = [#tpu.dimension_semantics<parallel>, #tpu.dimension_semantics<arbitrary>], iteration_bounds = array<i64: 2, 1>, scalar_prefetch = 0 : i64, scratch_operands = 1 : i64, tpu.core_type = #tpu.core_type<tc>, window_params = [{transform_indices = @transform_0, window_bounds = array<i64: 8, 128>}, {pipeline_mode = #tpu.pipeline_mode<synchronous>, transform_indices = @transform_1, window_bounds = array<i64: 128, 128>}, {pipeline_mode = #tpu.pipeline_mode<synchronous>, transform_indices = @transform_2, window_bounds = array<i64: 1, 128>}, {transform_indices = @transform_3, window_bounds = array<i64: 128, 128>}, {transform_indices = @transform_4, window_bounds = array<i64: 1, 128>}, {transform_indices = @transform_5, window_bounds = array<i64: 8, 128>}]} {
    %c0_i32 = arith.constant 0 : i32
    %0 = arith.cmpi eq, %arg1, %c0_i32 : i32
    %1 = arith.extui %0 : i1 to i32
    %c0_i32_0 = arith.constant 0 : i32
    %2 = arith.cmpi ne, %1, %c0_i32_0 : i32
    scf.if %2 {
      %c0_11 = arith.constant 0 : index
      %c0_12 = arith.constant 0 : index
      %23 = vector.load %arg2[%c0_11, %c0_12] : memref<8x128xf32, #tpu.memory_space<vmem>>, vector<8x128xf32>
      %24 = arith.truncf %23 : vector<8x128xf32> to vector<8x128xbf16>
      %c0_13 = arith.constant 0 : index
      %c0_14 = arith.constant 0 : index
      %25 = vector.load %arg3[%c0_13, %c0_14] : memref<128x128xbf16, #tpu.memory_space<vmem>>, vector<128x128xbf16>
      %cst_15 = arith.constant dense<0.000000e+00> : vector<8x128xf32>
      %26 = tpu.matmul %24, %25, %cst_15 {dimension_numbers = #tpu.dot_dimension_numbers<[1], [0], [0], [1], [0, 0, 1, 1], [], []>} : vector<8x128xbf16>, vector<128x128xbf16>, vector<8x128xf32> -> vector<8x128xf32>
      %c0_16 = arith.constant 0 : index
      %c0_17 = arith.constant 0 : index
      %27 = vector.load %arg4[%c0_16, %c0_17] : memref<1x128xf32, #tpu.memory_space<vmem>>, vector<1x128xf32>
      %28 = vector.broadcast %27 : vector<1x128xf32> to vector<8x128xf32>
      %29 = arith.addf %26, %28 : vector<8x128xf32>
      %cst_18 = arith.constant 0.000000e+00 : f32
      %30 = vector.broadcast %cst_18 : f32 to vector<8x128xf32>
      %31 = arith.maximumf %29, %30 : vector<8x128xf32>
      %c0_19 = arith.constant 0 : index
      %c0_20 = arith.constant 0 : index
      %32 = vector.load %arg8[%c0_19, %c0_20] : memref<8x128xf32, #tpu.memory_space<vmem>>, vector<8x128xf32>
      tpu.vector_store %arg8[%c0_19, %c0_20], %31 {strides = array<i32>} : memref<8x128xf32, #tpu.memory_space<vmem>>, vector<8x128xf32>,
    } else {
    }
    %c0 = arith.constant 0 : index
    %c0_1 = arith.constant 0 : index
    %3 = vector.load %arg8[%c0, %c0_1] : memref<8x128xf32, #tpu.memory_space<vmem>>, vector<8x128xf32>
    %4 = arith.truncf %3 : vector<8x128xf32> to vector<8x128xbf16>
    %c0_2 = arith.constant 0 : index
    %c0_3 = arith.constant 0 : index
    %5 = vector.load %arg5[%c0_2, %c0_3] : memref<128x128xbf16, #tpu.memory_space<vmem>>, vector<128x128xbf16>
    %cst = arith.constant dense<0.000000e+00> : vector<8x128xf32>
    %6 = tpu.matmul %4, %5, %cst {dimension_numbers = #tpu.dot_dimension_numbers<[1], [0], [0], [1], [0, 0, 1, 1], [], []>} : vector<8x128xbf16>, vector<128x128xbf16>, vector<8x128xf32> -> vector<8x128xf32>
    %c0_4 = arith.constant 0 : index
    %c0_5 = arith.constant 0 : index
    %7 = vector.load %arg6[%c0_4, %c0_5] : memref<1x128xf32, #tpu.memory_space<vmem>>, vector<1x128xf32>
    %8 = vector.broadcast %7 : vector<1x128xf32> to vector<8x128xf32>
    %9 = arith.addf %6, %8 : vector<8x128xf32>
    %10 = math.absf %9 : vector<8x128xf32>
    %cst_6 = arith.constant 0.000000e+00 : f32
    %11 = vector.broadcast %cst_6 : f32 to vector<8x128xf32>
    %12 = arith.subf %11, %10 : vector<8x128xf32>
    %13 = math.exp %12 : vector<8x128xf32>
    %cst_7 = arith.constant 1.000000e+00 : f32
    %14 = vector.broadcast %cst_7 : f32 to vector<8x128xf32>
    %15 = arith.addf %14, %13 : vector<8x128xf32>
    %16 = tpu.reciprocal %15 {approx = true} : vector<8x128xf32> -> vector<8x128xf32>
    %cst_8 = arith.constant 0.000000e+00 : f32
    %17 = vector.broadcast %cst_8 : f32 to vector<8x128xf32>
    %18 = arith.cmpf oge, %9, %17 : vector<8x128xf32>
    %19 = arith.mulf %13, %16 : vector<8x128xf32>
    %20 = arith.select %18, %16, %19 : vector<8x128xi1>, vector<8x128xf32>
    %21 = arith.truncf %20 : vector<8x128xf32> to vector<8x128xbf16>
    %c0_9 = arith.constant 0 : index
    %c0_10 = arith.constant 0 : index
    %22 = vector.load %arg7[%c0_9, %c0_10] : memref<8x128xbf16, #tpu.memory_space<vmem>>, vector<8x128xbf16>
    tpu.vector_store %arg7[%c0_9, %c0_10], %21 {strides = array<i32>} : memref<8x128xbf16, #tpu.memory_space<vmem>>, vector<8x128xbf16>,
    return
  }
  func.func @transform_0(%arg0: i32, %arg1: i32) -> (i32, i32) {
    %c0_i32 = arith.constant 0 : i32
    %c0_i32_0 = arith.constant 0 : i32
    return %arg0, %c0_i32 : i32, i32
  }
  func.func @transform_1(%arg0: i32, %arg1: i32) -> (i32, i32) {
    %c0_i32 = arith.constant 0 : i32
    %c0_i32_0 = arith.constant 0 : i32
    %c0_i32_1 = arith.constant 0 : i32
    return %c0_i32, %c0_i32_0 : i32, i32
  }
  func.func @transform_2(%arg0: i32, %arg1: i32) -> (i32, i32) {
    %c0_i32 = arith.constant 0 : i32
    %c0_i32_0 = arith.constant 0 : i32
    %c0_i32_1 = arith.constant 0 : i32
    return %c0_i32, %c0_i32_0 : i32, i32
  }
  func.func @transform_3(%arg0: i32, %arg1: i32) -> (i32, i32) {
    %c0_i32 = arith.constant 0 : i32
    %c0_i32_0 = arith.constant 0 : i32
    return %c0_i32, %arg1 : i32, i32
  }
  func.func @transform_4(%arg0: i32, %arg1: i32) -> (i32, i32) {
    %c0_i32 = arith.constant 0 : i32
    %c0_i32_0 = arith.constant 0 : i32
    return %c0_i32, %arg1 : i32, i32
  }
  func.func @transform_5(%arg0: i32, %arg1: i32) -> (i32, i32) {
    %c0_i32 = arith.constant 0 : i32
    return %arg0, %arg1 : i32, i32
  }
}

module attributes {stable_mosaic.version = 11 : i64} {
  func.func @_mlp_kernel(%arg0: i32, %arg1: i32, %arg2: memref<8x128xf32, #tpu.memory_space<vmem>>, %arg3: memref<128x128xbf16, #tpu.memory_space<vmem>>, %arg4: memref<1x128xf32, #tpu.memory_space<vmem>>, %arg5: memref<128x128xbf16, #tpu.memory_space<vmem>>, %arg6: memref<1x128xf32, #tpu.memory_space<vmem>>, %arg7: memref<8x128xbf16, #tpu.memory_space<vmem>>, %arg8: memref<8x128xf32, #tpu.memory_space<vmem>>) attributes {dimension_semantics = [#tpu.dimension_semantics<parallel>, #tpu.dimension_semantics<arbitrary>], iteration_bounds = array<i64: 2, 1>, scalar_prefetch = 0 : i64, scratch_operands = 1 : i64, tpu.core_type = #tpu.core_type<tc>, window_params = [{transform_indices = @transform_0, window_bounds = array<i64: 8, 128>}, {pipeline_mode = #tpu.pipeline_mode<synchronous>, transform_indices = @transform_1, window_bounds = array<i64: 128, 128>}, {pipeline_mode = #tpu.pipeline_mode<synchronous>, transform_indices = @transform_2, window_bounds = array<i64: 1, 128>}, {transform_indices = @transform_3, window_bounds = array<i64: 128, 128>}, {transform_indices = @transform_4, window_bounds = array<i64: 1, 128>}, {transform_indices = @transform_5, window_bounds = array<i64: 8, 128>}]} {
    %c0_i32 = arith.constant 0 : i32
    %0 = arith.cmpi eq, %arg1, %c0_i32 : i32
    %1 = arith.extui %0 : i1 to i32
    %c0_i32_0 = arith.constant 0 : i32
    %2 = arith.cmpi ne, %1, %c0_i32_0 : i32
    scf.if %2 {
      %c0_11 = arith.constant 0 : index
      %c0_12 = arith.constant 0 : index
      %23 = vector.load %arg2[%c0_11, %c0_12] : memref<8x128xf32, #tpu.memory_space<vmem>>, vector<8x128xf32>
      %24 = arith.truncf %23 : vector<8x128xf32> to vector<8x128xbf16>
      %c0_13 = arith.constant 0 : index
      %c0_14 = arith.constant 0 : index
      %25 = vector.load %arg3[%c0_13, %c0_14] : memref<128x128xbf16, #tpu.memory_space<vmem>>, vector<128x128xbf16>
      %cst_15 = arith.constant dense<0.000000e+00> : vector<8x128xf32>
      %26 = tpu.matmul %24, %25, %cst_15 {dimension_numbers = #tpu.dot_dimension_numbers<[1], [0], [0], [1], [0, 0, 1, 1], [], []>} : vector<8x128xbf16>, vector<128x128xbf16>, vector<8x128xf32> -> vector<8x128xf32>
      %c0_16 = arith.constant 0 : index
      %c0_17 = arith.constant 0 : index
      %27 = vector.load %arg4[%c0_16, %c0_17] : memref<1x128xf32, #tpu.memory_space<vmem>>, vector<1x128xf32>
      %28 = vector.broadcast %27 : vector<1x128xf32> to vector<8x128xf32>
      %29 = arith.addf %26, %28 : vector<8x128xf32>
      %cst_18 = arith.constant 0.000000e+00 : f32
      %30 = vector.broadcast %cst_18 : f32 to vector<8x128xf32>
      %31 = arith.maximumf %29, %30 : vector<8x128xf32>
      %c0_19 = arith.constant 0 : index
      %c0_20 = arith.constant 0 : index
      %32 = vector.load %arg8[%c0_19, %c0_20] : memref<8x128xf32, #tpu.memory_space<vmem>>, vector<8x128xf32>
      tpu.vector_store %arg8[%c0_19, %c0_20], %31 {strides = array<i32>} : memref<8x128xf32, #tpu.memory_space<vmem>>, vector<8x128xf32>,
    } else {
    }
    %c0 = arith.constant 0 : index
    %c0_1 = arith.constant 0 : index
    %3 = vector.load %arg8[%c0, %c0_1] : memref<8x128xf32, #tpu.memory_space<vmem>>, vector<8x128xf32>
    %4 = arith.truncf %3 : vector<8x128xf32> to vector<8x128xbf16>
    %c0_2 = arith.constant 0 : index
    %c0_3 = arith.constant 0 : index
    %5 = vector.load %arg5[%c0_2, %c0_3] : memref<128x128xbf16, #tpu.memory_space<vmem>>, vector<128x128xbf16>
    %cst = arith.constant dense<0.000000e+00> : vector<8x128xf32>
    %6 = tpu.matmul %4, %5, %cst {dimension_numbers = #tpu.dot_dimension_numbers<[1], [0], [0], [1], [0, 0, 1, 1], [], []>} : vector<8x128xbf16>, vector<128x128xbf16>, vector<8x128xf32> -> vector<8x128xf32>
    %c0_4 = arith.constant 0 : index
    %c0_5 = arith.constant 0 : index
    %7 = vector.load %arg6[%c0_4, %c0_5] : memref<1x128xf32, #tpu.memory_space<vmem>>, vector<1x128xf32>
    %8 = vector.broadcast %7 : vector<1x128xf32> to vector<8x128xf32>
    %9 = arith.addf %6, %8 : vector<8x128xf32>
    %10 = math.absf %9 : vector<8x128xf32>
    %cst_6 = arith.constant 0.000000e+00 : f32
    %11 = vector.broadcast %cst_6 : f32 to vector<8x128xf32>
    %12 = arith.subf %11, %10 : vector<8x128xf32>
    %13 = math.exp %12 : vector<8x128xf32>
    %cst_7 = arith.constant 1.000000e+00 : f32
    %14 = vector.broadcast %cst_7 : f32 to vector<8x128xf32>
    %15 = arith.addf %14, %13 : vector<8x128xf32>
    %16 = tpu.reciprocal %15 {approx = true} : vector<8x128xf32> -> vector<8x128xf32>
    %cst_8 = arith.constant 0.000000e+00 : f32
    %17 = vector.broadcast %cst_8 : f32 to vector<8x128xf32>
    %18 = arith.cmpf oge, %9, %17 : vector<8x128xf32>
    %19 = arith.mulf %13, %16 : vector<8x128xf32>
    %20 = arith.select %18, %16, %19 : vector<8x128xi1>, vector<8x128xf32>
    %21 = arith.truncf %20 : vector<8x128xf32> to vector<8x128xbf16>
    %c0_9 = arith.constant 0 : index
    %c0_10 = arith.constant 0 : index
    %22 = vector.load %arg7[%c0_9, %c0_10] : memref<8x128xbf16, #tpu.memory_space<vmem>>, vector<8x128xbf16>
    tpu.vector_store %arg7[%c0_9, %c0_10], %21 {strides = array<i32>} : memref<8x128xbf16, #tpu.memory_space<vmem>>, vector<8x128xbf16>,
    return
  }
  func.func @transform_0(%arg0: i32, %arg1: i32) -> (i32, i32) {
    %c0_i32 = arith.constant 0 : i32
    %c0_i32_0 = arith.constant 0 : i32
    return %arg0, %c0_i32 : i32, i32
  }
  func.func @transform_1(%arg0: i32, %arg1: i32) -> (i32, i32) {
    %c0_i32 = arith.constant 0 : i32
    %c0_i32_0 = arith.constant 0 : i32
    %c0_i32_1 = arith.constant 0 : i32
    return %c0_i32, %c0_i32_0 : i32, i32
  }
  func.func @transform_2(%arg0: i32, %arg1: i32) -> (i32, i32) {
    %c0_i32 = arith.constant 0 : i32
    %c0_i32_0 = arith.constant 0 : i32
    %c0_i32_1 = arith.constant 0 : i32
    return %c0_i32, %c0_i32_0 : i32, i32
  }
  func.func @transform_3(%arg0: i32, %arg1: i32) -> (i32, i32) {
    %c0_i32 = arith.constant 0 : i32
    %c0_i32_0 = arith.constant 0 : i32
    return %c0_i32, %arg1 : i32, i32
  }
  func.func @transform_4(%arg0: i32, %arg1: i32) -> (i32, i32) {
    %c0_i32 = arith.constant 0 : i32
    %c0_i32_0 = arith.constant 0 : i32
    return %c0_i32, %arg1 : i32, i32
  }
  func.func @transform_5(%arg0: i32, %arg1: i32) -> (i32, i32) {
    %c0_i32 = arith.constant 0 : i32
    return %arg0, %arg1 : i32, i32
  }
}

</mosaic_0001>

<bundles_post_ra>
// kernel: tpu_custom_call.1
= control target key start
LH: loop header
LB: loop body
LE: loop exit
PB: predicated region body
PF: predicated region fallthrough
CT: control target
= control target key end

     0   :  { %10 = vsyncpa [#allocation4], 0  ;;  %s1177_s0 = inlined_call_operand.hbm [shape: f32[16,128], index: 0, kind: input, shape index: {}]   ;;  %s1178_s1 = inlined_call_operand.hbm [shape: bf16[128,128], index: 1, kind: input, shape index: {}]   ;;  %s1179_s2 = inlined_call_operand.vmem [shape: f32[1,128], index: 2, kind: input, shape index: {}]   ;;  %s1180_s3 = inlined_call_operand.hbm [shape: bf16[128,128], index: 3, kind: input, shape index: {}]   ;;  %s1181_s4 = inlined_call_operand.vmem [shape: f32[1,128], index: 4, kind: input, shape index: {}]   ;;  %s1182_s5 = inlined_call_operand.hbm [shape: bf16[16,128], index: 5, kind: output, shape index: {}]  }
   0x1   :  { %12 = vsyncpa [#allocation4 + $0x1], 0 }
   0x2   :  { %13 = vsyncpa [#allocation7], 0 }
   0x3   :  { %14 = vsyncpa [#allocation5], 0 }
   0x4   :  { %16 = vsyncpa [#allocation5 + $0x1], 0  ;;  %s1023_s18 = smov 0   ;;  %s1025_s19 = smov 0  }
   0x5   :  { %s1027_s20 = smov 0   ;;  %s1029_s21 = smov 0  }
   0x6   :  { %s1031_s22 = smov 0   ;;  %s1033_s23 = smov 0  }
   0x7 LB: > { %s622_s24 = sadd.s32 4294967295, %s987_s23   ;;  %p624_p0 = scmp.ge.s32.totalorder %s987_s23, 1  ;;  %s987_s23 = sphi %s1033_s23, %s22_s23   ;;  %s983_s22 = sphi %s1031_s22, %s1192_s22   ;;  %s979_s21 = sphi %s1029_s21, %s1191_s21   ;;  %s975_s20 = sphi %s1027_s20, %s1190_s20   ;;  %s971_s19 = sphi %s1025_s19, %s1189_s19   ;;  %s967_s18 = sphi %s1023_s18, %s1188_s18  }
   0x8   : > { %p1057_p1 = scmp.eq.s32.totalorder %s622_s24, 0  ;;  %p187_p2 = scmp.lt.s32.totalorder %s987_s23, 3 }
   0x9   : > { %s198_s28 = sshll.u32 %s1178_s1, 4  ;;  %s989_s30 = smov [#allocation6]   ;;  %s199_s28 = int_to_ptr.hbm [resolvable:$true] %s198_s28 }
   0xa   : > { %p1065_p3 = pnand %p624_p0, %p187_p2  ;;  %s200_s6 = sshll.u32 %s989_s30, 4  ;;  %s201_s6 = int_to_ptr.vmem [resolvable:$true] %s200_s6 }
   0xb   : > { %p628_p6 = scmp.ge.s32.totalorder %s987_s23, 2  ;;  %s217_s9 = sshll.u32 %s1180_s3, 4  ;;  %s218_s9 = int_to_ptr.hbm [resolvable:$true] %s217_s9 }
   0xc   : > { %p732_p4 = pneg %p1065_p3  ;;  %s990_s10 = smov 64  }
   0xd   : > { %s991_s11 = smov 4   ;;  %s992_s12 = smov [#allocation8]  }
   0xe   : > { %p733_p5 = pnand %p732_p4, %p1057_p1  ;;  %s219_s13 = sshll.u32 %s992_s12, 4  ;;  %s220_s13 = int_to_ptr.vmem [resolvable:$true] %s219_s13 }
   0xf   : > { %s34_s14 = sadd.s32 1, %s983_s22  ;;  %s623_s15 = sadd.s32 4294967294, %s987_s23  }
  0x10   : > { %735 = dma.hbm_to_vmem [thread:$0]  (!%p733_p5), %s199_s28, 1024, %s201_s6, [#allocation7], %s990_s10, %s990_s10, %s991_s11  }
  0x11   : > { %738 = dma.hbm_to_vmem [thread:$0]  (!%p733_p5), %s218_s9, 1024, %s220_s13, [#allocation7], %s990_s10, %s990_s10, %s991_s11  }
  0x12   : > { %p36_p7 = scmp.ge.s32.totalorder %s34_s14, 2  ;;  %s41_s16 = sadd.s32 1, %s975_s20 }
  0x13   : > { %p48_p8 = scmp.ne.s32.totalorder %s975_s20, %s971_s19  ;;  %p49_p9 = scmp.eq.s32.totalorder %s987_s23, 0 }
  0x14   : > { %s1194_s14 = smov (%p36_p7, %s34_s14), 0  ;;  %p54_p10 = scmp.ne.s32.totalorder %s971_s19, %s967_s18 }
  0x15   : > { %s38_s17 = ssub.s32 %s983_s22, %s1194_s14  ;;  %p174_p11 = scmp.eq.s32.totalorder %s622_s24, 1 }
  0x16   : > { %p39_p12 = scmp.eq.s32.totalorder %s38_s17, 0  ;;  %p1093_p13 = por %p1057_p1, %p54_p10 }
  0x17   : > { %p1097_p0 = por %p174_p11, %p48_p8  ;;  %p180_p2 = scmp.eq.s32.totalorder %s623_s15, 1 }
  0x18   : > { %s1102_s28 = scalar_select %p39_p12, %s975_s20, %s41_s16  }
  0x19   : > { %p50_p4 = por %p49_p9, %p48_p8  ;;  %p1104_p5 = por %p180_p2, %p54_p10 }
  0x1a   : > { %s239_s6 = sand.u32 1, %s975_s20   ;;  %s630_s24 = sshll.u32 %s983_s22, 3 }
  0x1b   : > { %p749_p7 = scmp.lt.s32.totalorder %s987_s23, 2  ;;  %s629_s7 = sshll.u32 %s239_s6, 3 }
  0x1c   : > { %s247_s10 = scalar_lea.hbm %s1177_s0, %s630_s24  ;;  %s243_s12 = scalar_lea.vmem [#allocation3], %s629_s7 }
  0x1d   : > { %s249_s11 = sshll.u32 %s247_s10, 4  ;;  %s251_s13 = sshll.u32 %s243_s12, 4  ;;  %s250_s11 = int_to_ptr.hbm [resolvable:$true] %s249_s11  ;;  %s252_s13 = int_to_ptr.vmem [resolvable:$true] %s251_s13 }
  0x1e   : > { %p740_p11 = pnand %p749_p7, %p50_p4  ;;  %s240_s15 = scalar_lea.sflag [#allocation4], %s239_s6 }
  0x1f   : > { %260 = sbr.rel (%p1065_p3) target bundleno = 361 (0x169), region = 40  ;;  %s1117_s16 = sand.u32 (!%p1065_p3), 1, %s971_s19  }
  0x20   : > { %742 = dma.hbm_to_vmem [thread:$0]  (!%p740_p11), %s250_s11, 128, %s252_s13, %s240_s15  }
  0x21   : > { %s632_s17 = sshll.u32 (!%p1065_p3), %s1117_s16, 3  ;;  %s263_s8 = scalar_lea.sflag (!%p1065_p3), [#allocation4], %s1117_s16 }
  0x22   : > { %s1121_s24 = scalar_lea.vmem (!%p1065_p3), [#allocation3], %s632_s17 }
  0x24   : > { %954 = dma.done.wait (%p1093_p13), %s263_s8, 128  }
  0x25   : > { %956 = vsyncadd (%p1093_p13), %s263_s8, 4294967168 }
  0x26   : > { %958 = dma.done.wait (%p1057_p1), [#allocation7], 2048  }
  0x27   : > { %960 = vsyncadd (%p1057_p1), [#allocation7], 4294965248  ;;  %v711_v0 = vld [vmem:[#allocation6 + $0x38] sm:$0xff]  ;;  %v710_v1 = vld [vmem:[#allocation6 + $0x30] sm:$0xff]  ;;  %s635_s7 = sshll.u32 %s1117_s16, 2  ;;  %s701_s9 = sshll.u32 %s979_s21, 2 }
  0x28   : > { %384 = vmatpush.bf16.msra.mxu0 %v711_v0  ;;  %v719_v2 = vld [vmem:[#allocation8 + $0x38] sm:$0xff]  ;;  %v718_v3 = vld [vmem:[#allocation8 + $0x30] sm:$0xff]  ;;  %v709_v4 = vld [vmem:[#allocation6 + $0x28] sm:$0xff]  ;;  %s505_s12 = scalar_lea.hbm %s1182_s5, %s701_s9  ;;  %s306_s13 = scalar_lea.vmem [#allocation9], %s635_s7 }
  0x29   : > { %469 = vmatpush.bf16.msra.mxu1 %v719_v2  ;;  %v717_v5 = vld [vmem:[#allocation8 + $0x28] sm:$0xff]  ;;  %v708_v6 = vld [vmem:[#allocation6 + $0x20] sm:$0xff]  ;;  %v707_v8 = vld [vmem:[#allocation6 + $0x18] sm:$0xff]  ;;  %s507_s15 = sshll.u32 %s306_s13, 4  ;;  %s509_s17 = sshll.u32 %s505_s12, 4  ;;  %s508_s15 = int_to_ptr.vmem [resolvable:$true] %s507_s15  ;;  %s510_s17 = int_to_ptr.hbm [resolvable:$true] %s509_s17 }
  0x2a   : > { %v716_v7 = vld [vmem:[#allocation8 + $0x20] sm:$0xff]  ;;  %v715_v9 = vld [vmem:[#allocation8 + $0x18] sm:$0xff]  ;;  %v706_v10 = vld [vmem:[#allocation6 + $0x10] sm:$0xff]  ;;  %s494_s8 = scalar_lea.sflag [#allocation5], %s1117_s16  ;;  %s921_s26 = scalar_lea.hbm %s1182_s5, 8 }
  0x2b   : > { %v714_v11 = vld [vmem:[#allocation8 + $0x10] sm:$0xff]  ;;  %v705_v12 = vld [vmem:[#allocation6 + $0x8] sm:$0xff]  ;;  %v704_v13 = vld [vmem:[#allocation6] sm:$0xff] }
  0x2c   : > { %385 = vmatpush.bf16.msra.mxu0 %v710_v1  ;;  %v314_v14 = vld [vmem:[%s1121_s24] sm:$0xff]  ;;  %v713_v16 = vld [vmem:[#allocation8 + $0x8] sm:$0xff]  ;;  %v712_v17 = vld [vmem:[#allocation8] sm:$0xff]  ;;  %s915_s24 = sshra.s32 %s510_s17, 4  ;;  %s916_s24 = int_to_ptr.hbm [resolvable:$true] %s915_s24 }
  0x2d   : > { %470 = vmatpush.bf16.msra.mxu1 %v718_v3  ;;  %v315_v15 = vpack.c.bf16 %v314_v14, %v314_v14  ;;  %v805_v18 = vld [vmem:[%s1179_s2] ss:$0 sm:$0xff]  ;;  %s917_s21 = scalar_lea.hbm %s916_s24, 4  ;;  %p922_p9 = scmp.lt.s32.totalorder %s916_s24, %s1182_s5 }
  0x2e   : > { %v806_v24 = vld [vmem:[%s1181_s4] ss:$0 sm:$0xff]  ;;  %p918_p1 = scmp.ne.s32.totalorder %s916_s24, %s917_s21  ;;  %p923_p10 = scmp.lt.s32.totalorder %s921_s26, %s917_s21 }
  0x30   : > { %386 = vmatpush.bf16.msra.mxu0 %v709_v4  ;;  %p919_p3 = pnand %p918_p1, %p1097_p0  ;;  %p924_p12 = por %p923_p10, %p922_p9 }
  0x31   : > { %471 = vmatpush.bf16.msra.mxu1 %v717_v5 }
  0x32   : > { %p920_p8 = pneg %p919_p3 }
  0x34   : > { %387 = vmatpush.bf16.msra.mxu0 %v708_v6  ;;  %p925_p13 = pnand %p924_p12, %p920_p8 }
  0x35   : > { %472 = vmatpush.bf16.msra.mxu1 %v716_v7 }
  0x38   : > { %388 = vmatpush.bf16.msra.mxu0 %v707_v8 }
  0x39   : > { %473 = vmatpush.bf16.msra.mxu1 %v715_v9 }
  0x3c   : > { %389 = vmatpush.bf16.msra.mxu0 %v706_v10 }
  0x3d   : > { %474 = vmatpush.bf16.msra.mxu1 %v714_v11 }
  0x40   : > { %390 = vmatpush.bf16.msra.mxu0 %v705_v12 }
  0x41   : > { %475 = vmatpush.bf16.msra.mxu1 %v713_v16 }
  0x44   : > { %391 = vmatpush.bf16.msra.mxu0 %v704_v13 }
  0x45   : > { %476 = vmatpush.bf16.msra.mxu1 %v712_v17 }
  0x47   : > { %392 = vmatmul.bf16.vlgmr.msra.gmra.mxu0 %v315_v15 }
  0xc4   : > { %v393_v19 = vpop.f32.mrf.mxu0 }
  0xc5   : > { %v394_v20 = vadd.f32 %v805_v18, %v393_v19 }
  0xc7   : > { %v397_v21 = vmax.f32 %v394_v20, 0.0 }
  0xc9   : > { %v400_v22 = vpack.c.bf16 %v397_v21, %v397_v21 }
  0xcb   : > { %477 = vmatmul.bf16.vlgmr.msra.gmra.mxu1 %v400_v22 }
  0xcc   : > { %v395_v23 = vpop.f32.mrf.mxu0 }
 0x148   : > { %v478_v25 = vpop.f32.mrf.mxu1 }
 0x149   : > { %v479_v26 = vadd.f32 %v806_v24, %v478_v25 }
 0x14b   : > { %v482_v27 = vand.u32 2147483647, %v479_v26  ;;  %vm488_vm0 = vcmp.ge.f32.partialorder %v479_v26, 0.0 }
 0x14d   : > { %v483_v28 = vsub.f32 0.0, %v482_v27 }
 0x14f   : > { %v484_v29 = vmul.f32 1.442695, %v483_v28 }
 0x150   : > { %v480_v30 = vpop.f32.mrf.mxu1 }
 0x151   : > { %807 = vpow2.f32 %v484_v29 }
 0x157   : > { %v808_v31 = vpop.eup %807 }
 0x158   : > { %v486_v32 = vadd.f32 1.0, %v808_v31 }
 0x15a   : > { %809 = vrcp.f32 %v486_v32 }
 0x160   : > { %v810_v33 = vpop.eup %809 }
 0x161   : > { %v489_v34 = vmul.f32 %v810_v33, %v808_v31 }
 0x163   : > { %v490_v35 = vsel %vm488_vm0, %v810_v33, %v489_v34 }
 0x164   : > { %v491_v36 = vpack.c.bf16 %v490_v35, %v490_v35 }
 0x166   : > { %492 = vst [vmem:[%s306_s13] sm:$0xf] %v491_v36 }
 0x167   : > { %928 = shalt.err (!%p925_p13)
}
 0x168   : > { %730 = dma.vmem_to_hbm [thread:$0]  (%p1097_p0), %s508_s15, 64, %s510_s17, %s494_s8  }
 0x169 PF: > { %s521_s16 = sand.u32 1, %s967_s18   ;;  %p744_p2 = pnand %p628_p6, %p1104_p5 }
 0x16a   : > { %s522_s9 = scalar_lea.sflag [#allocation5], %s521_s16 }
 0x16b   : > { %p745_p4 = pneg %p744_p2 }
 0x16d   : > { %962 = dma.done.wait (%p745_p4), %s522_s9, 64  }
 0x16e   : > { %964 = vsyncadd (%p745_p4), %s522_s9, 4294967232  ;;  %s22_s23 = sadd.s32 1, %s987_s23   ;;  %s1188_s18 = smov %s971_s19 }
 0x16f   : > { %p19_p7 = scmp.ge.s32.totalorder %s22_s23, 4   ;;  %s1189_s19 = smov %s975_s20 }
 0x170   : > { %s1190_s20 = smov %s1102_s28  ;;  %s1191_s21 = smov %s983_s22 }
 0x171   : > { %s1192_s22 = smov %s1194_s14  ;;  %21 = sbr.rel (!%p19_p7) target bundleno = 7 (0x7), region = 101 }
 0x176   :  { %528 = vsyncpa [#allocation4], 1 }
 0x177   :  { %530 = vsyncpa [#allocation4 + $0x1], 1 }
 0x178   :  { %531 = vsyncpa [#allocation7], 1 }
 0x179   :  { %532 = vsyncpa [#allocation5], 1 }
 0x17a   :  { %534 = vsyncpa [#allocation5 + $0x1], 1 }

// kernel: tpu_custom_call.1
= control target key start
LH: loop header
LB: loop body
LE: loop exit
PB: predicated region body
PF: predicated region fallthrough
CT: control target
= control target key end

     0   :  { %10 = vsyncpa [#allocation4], 0  ;;  %s1177_s0 = inlined_call_operand.hbm [shape: f32[16,128], index: 0, kind: input, shape index: {}]   ;;  %s1178_s1 = inlined_call_operand.hbm [shape: bf16[128,128], index: 1, kind: input, shape index: {}]   ;;  %s1179_s2 = inlined_call_operand.vmem [shape: f32[1,128], index: 2, kind: input, shape index: {}]   ;;  %s1180_s3 = inlined_call_operand.hbm [shape: bf16[128,128], index: 3, kind: input, shape index: {}]   ;;  %s1181_s4 = inlined_call_operand.vmem [shape: f32[1,128], index: 4, kind: input, shape index: {}]   ;;  %s1182_s5 = inlined_call_operand.hbm [shape: bf16[16,128], index: 5, kind: output, shape index: {}]  }
   0x1   :  { %12 = vsyncpa [#allocation4 + $0x1], 0 }
   0x2   :  { %13 = vsyncpa [#allocation7], 0 }
   0x3   :  { %14 = vsyncpa [#allocation5], 0 }
   0x4   :  { %16 = vsyncpa [#allocation5 + $0x1], 0  ;;  %s1023_s18 = smov 0   ;;  %s1025_s19 = smov 0  }
   0x5   :  { %s1027_s20 = smov 0   ;;  %s1029_s21 = smov 0  }
   0x6   :  { %s1031_s22 = smov 0   ;;  %s1033_s23 = smov 0  }
   0x7 LB: > { %s622_s24 = sadd.s32 4294967295, %s987_s23   ;;  %p624_p0 = scmp.ge.s32.totalorder %s987_s23, 1  ;;  %s987_s23 = sphi %s1033_s23, %s22_s23   ;;  %s983_s22 = sphi %s1031_s22, %s1192_s22   ;;  %s979_s21 = sphi %s1029_s21, %s1191_s21   ;;  %s975_s20 = sphi %s1027_s20, %s1190_s20   ;;  %s971_s19 = sphi %s1025_s19, %s1189_s19   ;;  %s967_s18 = sphi %s1023_s18, %s1188_s18  }
   0x8   : > { %p1057_p1 = scmp.eq.s32.totalorder %s622_s24, 0  ;;  %p187_p2 = scmp.lt.s32.totalorder %s987_s23, 3 }
   0x9   : > { %s198_s28 = sshll.u32 %s1178_s1, 4  ;;  %s989_s30 = smov [#allocation6]   ;;  %s199_s28 = int_to_ptr.hbm [resolvable:$true] %s198_s28 }
   0xa   : > { %p1065_p3 = pnand %p624_p0, %p187_p2  ;;  %s200_s6 = sshll.u32 %s989_s30, 4  ;;  %s201_s6 = int_to_ptr.vmem [resolvable:$true] %s200_s6 }
   0xb   : > { %p628_p6 = scmp.ge.s32.totalorder %s987_s23, 2  ;;  %s217_s9 = sshll.u32 %s1180_s3, 4  ;;  %s218_s9 = int_to_ptr.hbm [resolvable:$true] %s217_s9 }
   0xc   : > { %p732_p4 = pneg %p1065_p3  ;;  %s990_s10 = smov 64  }
   0xd   : > { %s991_s11 = smov 4   ;;  %s992_s12 = smov [#allocation8]  }
   0xe   : > { %p733_p5 = pnand %p732_p4, %p1057_p1  ;;  %s219_s13 = sshll.u32 %s992_s12, 4  ;;  %s220_s13 = int_to_ptr.vmem [resolvable:$true] %s219_s13 }
   0xf   : > { %s34_s14 = sadd.s32 1, %s983_s22  ;;  %s623_s15 = sadd.s32 4294967294, %s987_s23  }
  0x10   : > { %735 = dma.hbm_to_vmem [thread:$0]  (!%p733_p5), %s199_s28, 1024, %s201_s6, [#allocation7], %s990_s10, %s990_s10, %s991_s11  }
  0x11   : > { %738 = dma.hbm_to_vmem [thread:$0]  (!%p733_p5), %s218_s9, 1024, %s220_s13, [#allocation7], %s990_s10, %s990_s10, %s991_s11  }
  0x12   : > { %p36_p7 = scmp.ge.s32.totalorder %s34_s14, 2  ;;  %s41_s16 = sadd.s32 1, %s975_s20 }
  0x13   : > { %p48_p8 = scmp.ne.s32.totalorder %s975_s20, %s971_s19  ;;  %p49_p9 = scmp.eq.s32.totalorder %s987_s23, 0 }
  0x14   : > { %s1194_s14 = smov (%p36_p7, %s34_s14), 0  ;;  %p54_p10 = scmp.ne.s32.totalorder %s971_s19, %s967_s18 }
  0x15   : > { %s38_s17 = ssub.s32 %s983_s22, %s1194_s14  ;;  %p174_p11 = scmp.eq.s32.totalorder %s622_s24, 1 }
  0x16   : > { %p39_p12 = scmp.eq.s32.totalorder %s38_s17, 0  ;;  %p1093_p13 = por %p1057_p1, %p54_p10 }
  0x17   : > { %p1097_p0 = por %p174_p11, %p48_p8  ;;  %p180_p2 = scmp.eq.s32.totalorder %s623_s15, 1 }
  0x18   : > { %s1102_s28 = scalar_select %p39_p12, %s975_s20, %s41_s16  }
  0x19   : > { %p50_p4 = por %p49_p9, %p48_p8  ;;  %p1104_p5 = por %p180_p2, %p54_p10 }
  0x1a   : > { %s239_s6 = sand.u32 1, %s975_s20   ;;  %s630_s24 = sshll.u32 %s983_s22, 3 }
  0x1b   : > { %p749_p7 = scmp.lt.s32.totalorder %s987_s23, 2  ;;  %s629_s7 = sshll.u32 %s239_s6, 3 }
  0x1c   : > { %s247_s10 = scalar_lea.hbm %s1177_s0, %s630_s24  ;;  %s243_s12 = scalar_lea.vmem [#allocation3], %s629_s7 }
  0x1d   : > { %s249_s11 = sshll.u32 %s247_s10, 4  ;;  %s251_s13 = sshll.u32 %s243_s12, 4  ;;  %s250_s11 = int_to_ptr.hbm [resolvable:$true] %s249_s11  ;;  %s252_s13 = int_to_ptr.vmem [resolvable:$true] %s251_s13 }
  0x1e   : > { %p740_p11 = pnand %p749_p7, %p50_p4  ;;  %s240_s15 = scalar_lea.sflag [#allocation4], %s239_s6 }
  0x1f   : > { %260 = sbr.rel (%p1065_p3) target bundleno = 361 (0x169), region = 40  ;;  %s1117_s16 = sand.u32 (!%p1065_p3), 1, %s971_s19  }
  0x20   : > { %742 = dma.hbm_to_vmem [thread:$0]  (!%p740_p11), %s250_s11, 128, %s252_s13, %s240_s15  }
  0x21   : > { %s632_s17 = sshll.u32 (!%p1065_p3), %s1117_s16, 3  ;;  %s263_s8 = scalar_lea.sflag (!%p1065_p3), [#allocation4], %s1117_s16 }
  0x22   : > { %s1121_s24 = scalar_lea.vmem (!%p1065_p3), [#allocation3], %s632_s17 }
  0x24   : > { %954 = dma.done.wait (%p1093_p13), %s263_s8, 128  }
  0x25   : > { %956 = vsyncadd (%p1093_p13), %s263_s8, 4294967168 }
  0x26   : > { %958 = dma.done.wait (%p1057_p1), [#allocation7], 2048  }
  0x27   : > { %960 = vsyncadd (%p1057_p1), [#allocation7], 4294965248  ;;  %v711_v0 = vld [vmem:[#allocation6 + $0x38] sm:$0xff]  ;;  %v710_v1 = vld [vmem:[#allocation6 + $0x30] sm:$0xff]  ;;  %s635_s7 = sshll.u32 %s1117_s16, 2  ;;  %s701_s9 = sshll.u32 %s979_s21, 2 }
  0x28   : > { %384 = vmatpush.bf16.msra.mxu0 %v711_v0  ;;  %v719_v2 = vld [vmem:[#allocation8 + $0x38] sm:$0xff]  ;;  %v718_v3 = vld [vmem:[#allocation8 + $0x30] sm:$0xff]  ;;  %v709_v4 = vld [vmem:[#allocation6 + $0x28] sm:$0xff]  ;;  %s505_s12 = scalar_lea.hbm %s1182_s5, %s701_s9  ;;  %s306_s13 = scalar_lea.vmem [#allocation9], %s635_s7 }
  0x29   : > { %469 = vmatpush.bf16.msra.mxu1 %v719_v2  ;;  %v717_v5 = vld [vmem:[#allocation8 + $0x28] sm:$0xff]  ;;  %v708_v6 = vld [vmem:[#allocation6 + $0x20] sm:$0xff]  ;;  %v707_v8 = vld [vmem:[#allocation6 + $0x18] sm:$0xff]  ;;  %s507_s15 = sshll.u32 %s306_s13, 4  ;;  %s509_s17 = sshll.u32 %s505_s12, 4  ;;  %s508_s15 = int_to_ptr.vmem [resolvable:$true] %s507_s15  ;;  %s510_s17 = int_to_ptr.hbm [resolvable:$true] %s509_s17 }
  0x2a   : > { %v716_v7 = vld [vmem:[#allocation8 + $0x20] sm:$0xff]  ;;  %v715_v9 = vld [vmem:[#allocation8 + $0x18] sm:$0xff]  ;;  %v706_v10 = vld [vmem:[#allocation6 + $0x10] sm:$0xff]  ;;  %s494_s8 = scalar_lea.sflag [#allocation5], %s1117_s16  ;;  %s921_s26 = scalar_lea.hbm %s1182_s5, 8 }
  0x2b   : > { %v714_v11 = vld [vmem:[#allocation8 + $0x10] sm:$0xff]  ;;  %v705_v12 = vld [vmem:[#allocation6 + $0x8] sm:$0xff]  ;;  %v704_v13 = vld [vmem:[#allocation6] sm:$0xff] }
  0x2c   : > { %385 = vmatpush.bf16.msra.mxu0 %v710_v1  ;;  %v314_v14 = vld [vmem:[%s1121_s24] sm:$0xff]  ;;  %v713_v16 = vld [vmem:[#allocation8 + $0x8] sm:$0xff]  ;;  %v712_v17 = vld [vmem:[#allocation8] sm:$0xff]  ;;  %s915_s24 = sshra.s32 %s510_s17, 4  ;;  %s916_s24 = int_to_ptr.hbm [resolvable:$true] %s915_s24 }
  0x2d   : > { %470 = vmatpush.bf16.msra.mxu1 %v718_v3  ;;  %v315_v15 = vpack.c.bf16 %v314_v14, %v314_v14  ;;  %v805_v18 = vld [vmem:[%s1179_s2] ss:$0 sm:$0xff]  ;;  %s917_s21 = scalar_lea.hbm %s916_s24, 4  ;;  %p922_p9 = scmp.lt.s32.totalorder %s916_s24, %s1182_s5 }
  0x2e   : > { %v806_v24 = vld [vmem:[%s1181_s4] ss:$0 sm:$0xff]  ;;  %p918_p1 = scmp.ne.s32.totalorder %s916_s24, %s917_s21  ;;  %p923_p10 = scmp.lt.s32.totalorder %s921_s26, %s917_s21 }
  0x30   : > { %386 = vmatpush.bf16.msra.mxu0 %v709_v4  ;;  %p919_p3 = pnand %p918_p1, %p1097_p0  ;;  %p924_p12 = por %p923_p10, %p922_p9 }
  0x31   : > { %471 = vmatpush.bf16.msra.mxu1 %v717_v5 }
  0x32   : > { %p920_p8 = pneg %p919_p3 }
  0x34   : > { %387 = vmatpush.bf16.msra.mxu0 %v708_v6  ;;  %p925_p13 = pnand %p924_p12, %p920_p8 }
  0x35   : > { %472 = vmatpush.bf16.msra.mxu1 %v716_v7 }
  0x38   : > { %388 = vmatpush.bf16.msra.mxu0 %v707_v8 }
  0x39   : > { %473 = vmatpush.bf16.msra.mxu1 %v715_v9 }
  0x3c   : > { %389 = vmatpush.bf16.msra.mxu0 %v706_v10 }
  0x3d   : > { %474 = vmatpush.bf16.msra.mxu1 %v714_v11 }
  0x40   : > { %390 = vmatpush.bf16.msra.mxu0 %v705_v12 }
  0x41   : > { %475 = vmatpush.bf16.msra.mxu1 %v713_v16 }
  0x44   : > { %391 = vmatpush.bf16.msra.mxu0 %v704_v13 }
  0x45   : > { %476 = vmatpush.bf16.msra.mxu1 %v712_v17 }
  0x47   : > { %392 = vmatmul.bf16.vlgmr.msra.gmra.mxu0 %v315_v15 }
  0xc4   : > { %v393_v19 = vpop.f32.mrf.mxu0 }
  0xc5   : > { %v394_v20 = vadd.f32 %v805_v18, %v393_v19 }
  0xc7   : > { %v397_v21 = vmax.f32 %v394_v20, 0.0 }
  0xc9   : > { %v400_v22 = vpack.c.bf16 %v397_v21, %v397_v21 }
  0xcb   : > { %477 = vmatmul.bf16.vlgmr.msra.gmra.mxu1 %v400_v22 }
  0xcc   : > { %v395_v23 = vpop.f32.mrf.mxu0 }
 0x148   : > { %v478_v25 = vpop.f32.mrf.mxu1 }
 0x149   : > { %v479_v26 = vadd.f32 %v806_v24, %v478_v25 }
 0x14b   : > { %v482_v27 = vand.u32 2147483647, %v479_v26  ;;  %vm488_vm0 = vcmp.ge.f32.partialorder %v479_v26, 0.0 }
 0x14d   : > { %v483_v28 = vsub.f32 0.0, %v482_v27 }
 0x14f   : > { %v484_v29 = vmul.f32 1.442695, %v483_v28 }
 0x150   : > { %v480_v30 = vpop.f32.mrf.mxu1 }
 0x151   : > { %807 = vpow2.f32 %v484_v29 }
 0x157   : > { %v808_v31 = vpop.eup %807 }
 0x158   : > { %v486_v32 = vadd.f32 1.0, %v808_v31 }
 0x15a   : > { %809 = vrcp.f32 %v486_v32 }
 0x160   : > { %v810_v33 = vpop.eup %809 }
 0x161   : > { %v489_v34 = vmul.f32 %v810_v33, %v808_v31 }
 0x163   : > { %v490_v35 = vsel %vm488_vm0, %v810_v33, %v489_v34 }
 0x164   : > { %v491_v36 = vpack.c.bf16 %v490_v35, %v490_v35 }
 0x166   : > { %492 = vst [vmem:[%s306_s13] sm:$0xf] %v491_v36 }
 0x167   : > { %928 = shalt.err (!%p925_p13)
}
 0x168   : > { %730 = dma.vmem_to_hbm [thread:$0]  (%p1097_p0), %s508_s15, 64, %s510_s17, %s494_s8  }
 0x169 PF: > { %s521_s16 = sand.u32 1, %s967_s18   ;;  %p744_p2 = pnand %p628_p6, %p1104_p5 }
 0x16a   : > { %s522_s9 = scalar_lea.sflag [#allocation5], %s521_s16 }
 0x16b   : > { %p745_p4 = pneg %p744_p2 }
 0x16d   : > { %962 = dma.done.wait (%p745_p4), %s522_s9, 64  }
 0x16e   : > { %964 = vsyncadd (%p745_p4), %s522_s9, 4294967232  ;;  %s22_s23 = sadd.s32 1, %s987_s23   ;;  %s1188_s18 = smov %s971_s19 }
 0x16f   : > { %p19_p7 = scmp.ge.s32.totalorder %s22_s23, 4   ;;  %s1189_s19 = smov %s975_s20 }
 0x170   : > { %s1190_s20 = smov %s1102_s28  ;;  %s1191_s21 = smov %s983_s22 }
 0x171   : > { %s1192_s22 = smov %s1194_s14  ;;  %21 = sbr.rel (!%p19_p7) target bundleno = 7 (0x7), region = 101 }
 0x176   :  { %528 = vsyncpa [#allocation4], 1 }
 0x177   :  { %530 = vsyncpa [#allocation4 + $0x1], 1 }
 0x178   :  { %531 = vsyncpa [#allocation7], 1 }
 0x179   :  { %532 = vsyncpa [#allocation5], 1 }
 0x17a   :  { %534 = vsyncpa [#allocation5 + $0x1], 1 }

</bundles_post_ra>
